<compile_context>
chip_gen: v6e
topology: v6e:2x2x1
jax: 0.10.0
libtpu: 0.0.40
codegen_flags: <defaults>
</compile_context>

<pallas_src>
import functools
import math

import jax
import jax.numpy as jnp
from jax.experimental import pallas as pl
from jax.experimental.pallas import tpu as pltpu


def _detect_multi_tc():
    """True on chips with 2 TensorCores per chip (v7x); False on v5e/v6e."""
    try:
        kind = jax.devices()[0].device_kind.lower()
    except Exception:
        kind = ""
    return ("v7" in kind) or ("7x" in kind)


_MULTI_TC = _detect_multi_tc()
# Per-input per-step block footprint target (at native dtype) and VMEM limit.
_TARGET_BYTES = (8 if _MULTI_TC else 4) * 1024 * 1024
_VMEM_LIMIT = (48 if _MULTI_TC else 40) * 1024 * 1024


def _dice_sums_kernel(x_ref, y_ref, i_ref, u_ref, acc_i_ref, acc_u_ref,
                      *, cols, tile_n, need_mask, unroll):
    # x_ref, y_ref: (row_tile, tile_n) block of the folded inputs (native dtype).
    # i_ref, u_ref: (row_tile, 1) outputs, resident across the column axis.
    # acc_i_ref, acc_u_ref: (row_tile, 128) f32 lane-wide accumulators (VMEM).
    n = pl.program_id(1)                 # column-chunk (reduction) axis, innermost
    last = pl.num_programs(1) - 1
    num_chunks = tile_n // 128

    @pl.when(n == 0)
    def _init():
        acc_i_ref[...] = jnp.zeros_like(acc_i_ref)
        acc_u_ref[...] = jnp.zeros_like(acc_u_ref)

    def accumulate(masked):
        # Hoisted constants for the masked (tail) path only.
        if masked:
            lane = jax.lax.broadcasted_iota(
                jnp.int32, (x_ref.shape[0], 128), 1)
            base = n * tile_n

        def body(j, carry):
            acc_i, acc_u = carry
            off = pl.multiple_of(j * 128, 128)
            xs = jax.nn.sigmoid(x_ref[:, pl.ds(off, 128)].astype(jnp.float32))
            yv = y_ref[:, pl.ds(off, 128)].astype(jnp.float32)
            if masked:
                valid = (base + j * 128 + lane) < cols
                xs = jnp.where(valid, xs, 0.0)
                yv = jnp.where(valid, yv, 0.0)
            return acc_i + xs * yv, acc_u + xs + yv

        acc_i, acc_u = jax.lax.fori_loop(
            0, num_chunks, body, (acc_i_ref[...], acc_u_ref[...]),
            unroll=unroll)
        acc_i_ref[...] = acc_i
        acc_u_ref[...] = acc_u

    if need_mask:
        # Only the final column step can hold a partial block; keep the hot
        # path (all earlier steps) completely mask-free.
        @pl.when(n < last)
        def _main():
            accumulate(masked=False)

        @pl.when(n == last)
        def _tail():
            accumulate(masked=True)
    else:
        accumulate(masked=False)

    @pl.when(n == last)
    def _finish():
        # One cross-lane reduce + one narrow store per row block, at the end.
        i_ref[...] = jnp.sum(acc_i_ref[...], axis=1, keepdims=True)
        u_ref[...] = jnp.sum(acc_u_ref[...], axis=1, keepdims=True)


def _choose_fold(B, N, dtype):
    """Pick K so [B, N] folds to [B*K, N//K].

    Prefers rows that fill sublanes (mult of 8; mult of 16/32 for bf16/int8),
    lane-aligned cols, and (on multi-TC chips) rows >= 16 so the row axis can
    split across TensorCores. Ties break toward smaller K (wider cols ->
    bigger per-step blocks). K must divide N exactly (no padding)."""
    itemsize = jnp.dtype(dtype).itemsize
    pack = 8 * max(1, 4 // max(1, itemsize))   # sublane packing: f32=8, bf16=16, i8=32
    best_k, best_score = 1, -1
    for k in range(1, 257):
        if N % k:
            continue
        rows, cols = B * k, N // k
        if rows > 512 or cols < 128:
            continue
        score = 0
        if rows % 8 == 0:
            score += 8
        if rows % pack == 0:
            score += 2
        if cols % 128 == 0:
            score += 4
        if _MULTI_TC and rows % 8 == 0 and rows >= 16:
            score += 2     # enables >= 2 sublane-aligned row blocks (megacore)
        if score > best_score:   # strict '>' => ties pick the smallest K
            best_k, best_score = k, score
    return best_k


def _pick_row_tile(rows):
    """Row tile selection.

    Multi-TC chips (v7x): largest sublane-aligned tile leaving >= 2 row blocks
    so the 'parallel' row axis shards across both TensorCores.
    Single-TC chips (v5e/v6e): largest dividing tile (<= 64) — extra row blocks
    only add init/finalize epilogues there."""
    if rows % 8 != 0:
        return rows  # full-dim row block (allowed); only for awkward shapes
    if _MULTI_TC:
        for cand in (64, 32, 16, 8):
            if rows % cand == 0 and rows // cand >= 2:
                return cand
        return rows  # rows == 8: cannot split while staying sublane-aligned
    for cand in (64, 32, 16, 8):
        if rows % cand == 0:
            return cand
    return rows


def _dice_sums(x2, y2):
    """Per-row sums of sigmoid(x)*y and sigmoid(x)+y via a tiled Pallas reduction."""
    rows, cols = x2.shape
    row_tile = _pick_row_tile(rows)
    n_row = rows // row_tile

    # Column tile: multiple of 128, sized from the native dtype so the VMEM
    # block hits the per-generation byte target, never wider than the
    # (128-padded) cols.
    itemsize = max(jnp.dtype(x2.dtype).itemsize, jnp.dtype(y2.dtype).itemsize)
    cols_pad = pl.cdiv(cols, 128) * 128
    tile_n = (_TARGET_BYTES // (row_tile * itemsize)) // 128 * 128
    tile_n = max(128, min(tile_n, cols_pad))
    if cols % 128 == 0:
        # Snap down (within 2x of target) to a divisor of cols so the hot path
        # never needs the ragged-tail mask.
        snapped = 128
        for cand in range(tile_n, 127, -128):
            if cols % cand == 0:
                snapped = cand
                break
        if snapped * 2 >= tile_n:
            tile_n = snapped
    n_col = pl.cdiv(cols, tile_n)
    need_mask = (cols % tile_n) != 0
    unroll = max(1, min(8, tile_n // 128))

    kernel = functools.partial(_dice_sums_kernel, cols=cols, tile_n=tile_n,
                               need_mask=need_mask, unroll=unroll)

    i_sum, u_sum = pl.pallas_call(
        kernel,
        out_shape=(
            jax.ShapeDtypeStruct((rows, 1), jnp.float32),
            jax.ShapeDtypeStruct((rows, 1), jnp.float32),
        ),
        grid_spec=pltpu.PrefetchScalarGridSpec(
            num_scalar_prefetch=0,
            grid=(n_row, n_col),
            in_specs=[
                pl.BlockSpec((row_tile, tile_n), lambda r, n: (r, n)),
                pl.BlockSpec((row_tile, tile_n), lambda r, n: (r, n)),
            ],
            out_specs=[
                pl.BlockSpec((row_tile, 1), lambda r, n: (r, 0)),
                pl.BlockSpec((row_tile, 1), lambda r, n: (r, 0)),
            ],
            scratch_shapes=[
                pltpu.VMEM((row_tile, 128), jnp.float32),
                pltpu.VMEM((row_tile, 128), jnp.float32),
            ],
        ),
        compiler_params=pltpu.CompilerParams(
            dimension_semantics=("parallel", "arbitrary"),
            vmem_limit_bytes=_VMEM_LIMIT,
        ),
    )(x2, y2)
    return i_sum[:, 0], u_sum[:, 0]


@functools.partial(jax.jit, static_argnames=("image",))
def dice_loss(x, y, *, image=False):
    """JAX/Pallas equivalent of DiceLoss(image=image)(x, y) for NCHW inputs."""
    B = x.shape[0]
    N = math.prod(x.shape[1:])
    k = _choose_fold(B, N, x.dtype)
    rows, cols = B * k, N // k
    # Pure reshape (no dtype cast, no pad) — the kernel casts in-register.
    x2 = x.reshape(rows, cols)
    y2 = y.reshape(rows, cols)
    i_r, u_r = _dice_sums(x2, y2)
    # Recombine the K folded rows per image.
    i_b = i_r.reshape(B, k).sum(axis=1)
    u_b = u_r.reshape(B, k).sum(axis=1)
    if image:
        dice = (2.0 * i_b + 1.0) / (u_b + 1.0)
        return 1.0 - jnp.mean(dice)
    i_tot = jnp.sum(i_b)
    u_tot = jnp.sum(u_b)
    return 1.0 - (2.0 * i_tot + 1.0) / (u_tot + 1.0)


def _dice_loss_ref(x, y, *, image=False):
    xs = jax.nn.sigmoid(x.astype(jnp.float32))
    yv = y.astype(jnp.float32)
    if image:
        B = x.shape[0]
        i = (xs * yv).reshape(B, -1).sum(1)
        u = (xs + yv).reshape(B, -1).sum(1)
    else:
        i = (xs * yv).sum()
        u = (xs + yv).sum()
    dice = (2.0 * i + 1.0) / (u + 1.0)
    return 1.0 - jnp.mean(dice)


if __name__ == "__main__":
    key = jax.random.PRNGKey(0)

    # Case 1: lane-aligned NCHW (C*H*W multiple of 128) — no masking path.
    kx, ky, key = jax.random.split(key, 3)
    B, C, H, W = 2, 4, 16, 16
    x = jax.random.normal(kx, (B, C, H, W), dtype=jnp.float32)             # logits
    y = (jax.random.uniform(ky, (B, C, H, W)) > 0.5).astype(jnp.float32)   # binary targets

    out_global = jax.block_until_ready(dice_loss(x, y, image=False))
    out_image = jax.block_until_ready(dice_loss(x, y, image=True))
    assert jnp.allclose(out_global, _dice_loss_ref(x, y, image=False), atol=1e-5, rtol=1e-5)
    assert jnp.allclose(out_image, _dice_loss_ref(x, y, image=True), atol=1e-5, rtol=1e-5)

    # Case 2: non-lane-aligned spatial size — exercises the gated tail mask.
    kx2, ky2, key = jax.random.split(key, 3)
    x2 = jax.random.normal(kx2, (2, 3, 10, 10), dtype=jnp.float32)
    y2 = (jax.random.uniform(ky2, (2, 3, 10, 10)) > 0.5).astype(jnp.float32)
    out2 = jax.block_until_ready(dice_loss(x2, y2, image=True))
    assert jnp.allclose(out2, _dice_loss_ref(x2, y2, image=True), atol=1e-5, rtol=1e-5)

    # Case 3: wider spatial size — exercises the multi-chunk fori_loop path.
    kx3, ky3 = jax.random.split(key)
    x3 = jax.random.normal(kx3, (2, 4, 64, 64), dtype=jnp.float32)
    y3 = (jax.random.uniform(ky3, (2, 4, 64, 64)) > 0.5).astype(jnp.float32)
    out3_img = jax.block_until_ready(dice_loss(x3, y3, image=True))
    out3_glb = jax.block_until_ready(dice_loss(x3, y3, image=False))
    assert jnp.allclose(out3_img, _dice_loss_ref(x3, y3, image=True), atol=1e-5, rtol=1e-5)
    assert jnp.allclose(out3_glb, _dice_loss_ref(x3, y3, image=False), atol=1e-5, rtol=1e-5)

    print("KERNEL_OK")
</pallas_src>

<mosaic_0001>
module attributes {stable_mosaic.version = 11 : i64} {
  func.func @_dice_sums_kernel(%arg0: i32, %arg1: i32, %arg2: memref<8x256xf32, #tpu.memory_space<vmem>>, %arg3: memref<8x256xf32, #tpu.memory_space<vmem>>, %arg4: memref<8x1xf32, #tpu.memory_space<vmem>>, %arg5: memref<8x1xf32, #tpu.memory_space<vmem>>, %arg6: memref<8x128xf32, #tpu.memory_space<vmem>>, %arg7: memref<8x128xf32, #tpu.memory_space<vmem>>) attributes {dimension_semantics = [#tpu.dimension_semantics<parallel>, #tpu.dimension_semantics<arbitrary>], iteration_bounds = array<i64: 1, 1>, scalar_prefetch = 0 : i64, scratch_operands = 2 : i64, tpu.core_type = #tpu.core_type<tc>, window_params = [{transform_indices = @transform_0, window_bounds = array<i64: 8, 256>}, {transform_indices = @transform_1, window_bounds = array<i64: 8, 256>}, {transform_indices = @transform_2, window_bounds = array<i64: 8, 1>}, {transform_indices = @transform_3, window_bounds = array<i64: 8, 1>}]} {
    %c0_i32 = arith.constant 0 : i32
    %0 = arith.cmpi eq, %arg1, %c0_i32 : i32
    %1 = arith.extui %0 : i1 to i32
    %c0_i32_0 = arith.constant 0 : i32
    %2 = arith.cmpi ne, %1, %c0_i32_0 : i32
    scf.if %2 {
      %cst_17 = arith.constant 0.000000e+00 : f32
      %40 = vector.broadcast %cst_17 : f32 to vector<8x128xf32>
      %c0_18 = arith.constant 0 : index
      %c0_19 = arith.constant 0 : index
      %41 = vector.load %arg6[%c0_18, %c0_19] : memref<8x128xf32, #tpu.memory_space<vmem>>, vector<8x128xf32>
      tpu.vector_store %arg6[%c0_18, %c0_19], %40 {strides = array<i32>} : memref<8x128xf32, #tpu.memory_space<vmem>>, vector<8x128xf32>,
      %cst_20 = arith.constant 0.000000e+00 : f32
      %42 = vector.broadcast %cst_20 : f32 to vector<8x128xf32>
      %c0_21 = arith.constant 0 : index
      %c0_22 = arith.constant 0 : index
      %43 = vector.load %arg7[%c0_21, %c0_22] : memref<8x128xf32, #tpu.memory_space<vmem>>, vector<8x128xf32>
      tpu.vector_store %arg7[%c0_21, %c0_22], %42 {strides = array<i32>} : memref<8x128xf32, #tpu.memory_space<vmem>>, vector<8x128xf32>,
    } else {
    }
    %c0 = arith.constant 0 : index
    %c0_1 = arith.constant 0 : index
    %3 = vector.load %arg6[%c0, %c0_1] : memref<8x128xf32, #tpu.memory_space<vmem>>, vector<8x128xf32>
    %c0_2 = arith.constant 0 : index
    %c0_3 = arith.constant 0 : index
    %4 = vector.load %arg7[%c0_2, %c0_3] : memref<8x128xf32, #tpu.memory_space<vmem>>, vector<8x128xf32>
    %c0_i32_4 = arith.constant 0 : i32
    %c128_i32 = arith.constant 128 : i32
    %5 = arith.muli %c0_i32_4, %c128_i32 : i32
    %6 = tpu.assume_multiple %5, 128 : i32
    %c0_5 = arith.constant 0 : index
    %7 = arith.index_cast %6 : i32 to index
    %8 = vector.load %arg2[%c0_5, %7] : memref<8x256xf32, #tpu.memory_space<vmem>>, vector<8x128xf32>
    %9 = arith.negf %8 : vector<8x128xf32>
    %10 = math.exp %9 : vector<8x128xf32>
    %cst = arith.constant 1.000000e+00 : f32
    %11 = vector.broadcast %cst : f32 to vector<8x128xf32>
    %12 = arith.addf %11, %10 : vector<8x128xf32>
    %13 = arith.divf %11, %12 : vector<8x128xf32>
    %c0_6 = arith.constant 0 : index
    %14 = arith.index_cast %6 : i32 to index
    %15 = vector.load %arg3[%c0_6, %14] : memref<8x256xf32, #tpu.memory_space<vmem>>, vector<8x128xf32>
    %16 = arith.mulf %13, %15 : vector<8x128xf32>
    %17 = arith.addf %3, %16 : vector<8x128xf32>
    %18 = arith.addf %4, %13 : vector<8x128xf32>
    %19 = arith.addf %18, %15 : vector<8x128xf32>
    %c1_i32 = arith.constant 1 : i32
    %c128_i32_7 = arith.constant 128 : i32
    %20 = arith.muli %c1_i32, %c128_i32_7 : i32
    %21 = tpu.assume_multiple %20, 128 : i32
    %c0_8 = arith.constant 0 : index
    %22 = arith.index_cast %21 : i32 to index
    %23 = vector.load %arg2[%c0_8, %22] : memref<8x256xf32, #tpu.memory_space<vmem>>, vector<8x128xf32>
    %24 = arith.negf %23 : vector<8x128xf32>
    %25 = math.exp %24 : vector<8x128xf32>
    %cst_9 = arith.constant 1.000000e+00 : f32
    %26 = vector.broadcast %cst_9 : f32 to vector<8x128xf32>
    %27 = arith.addf %26, %25 : vector<8x128xf32>
    %28 = arith.divf %26, %27 : vector<8x128xf32>
    %c0_10 = arith.constant 0 : index
    %29 = arith.index_cast %21 : i32 to index
    %30 = vector.load %arg3[%c0_10, %29] : memref<8x256xf32, #tpu.memory_space<vmem>>, vector<8x128xf32>
    %31 = arith.mulf %28, %30 : vector<8x128xf32>
    %32 = arith.addf %17, %31 : vector<8x128xf32>
    %33 = arith.addf %19, %28 : vector<8x128xf32>
    %34 = arith.addf %33, %30 : vector<8x128xf32>
    %c2_i32 = arith.constant 2 : i32
    %c0_11 = arith.constant 0 : index
    %c0_12 = arith.constant 0 : index
    %35 = vector.load %arg6[%c0_11, %c0_12] : memref<8x128xf32, #tpu.memory_space<vmem>>, vector<8x128xf32>
    tpu.vector_store %arg6[%c0_11, %c0_12], %32 {strides = array<i32>} : memref<8x128xf32, #tpu.memory_space<vmem>>, vector<8x128xf32>,
    %c0_13 = arith.constant 0 : index
    %c0_14 = arith.constant 0 : index
    %36 = vector.load %arg7[%c0_13, %c0_14] : memref<8x128xf32, #tpu.memory_space<vmem>>, vector<8x128xf32>
    tpu.vector_store %arg7[%c0_13, %c0_14], %34 {strides = array<i32>} : memref<8x128xf32, #tpu.memory_space<vmem>>, vector<8x128xf32>,
    %c0_i32_15 = arith.constant 0 : i32
    %37 = arith.cmpi eq, %arg1, %c0_i32_15 : i32
    %38 = arith.extui %37 : i1 to i32
    %c0_i32_16 = arith.constant 0 : i32
    %39 = arith.cmpi ne, %38, %c0_i32_16 : i32
    scf.if %39 {
      %c0_17 = arith.constant 0 : index
      %c0_18 = arith.constant 0 : index
      %40 = vector.load %arg6[%c0_17, %c0_18] : memref<8x128xf32, #tpu.memory_space<vmem>>, vector<8x128xf32>
      %cst_19 = arith.constant dense<0.000000e+00> : vector<8xf32>
      %41 = vector.multi_reduction <add>, %40, %cst_19 [1] : vector<8x128xf32> to vector<8xf32>
      %42 = vector.shape_cast %41 : vector<8xf32> to vector<8x1xf32>
      %c0_20 = arith.constant 0 : index
      %c0_21 = arith.constant 0 : index
      %43 = vector.load %arg4[%c0_20, %c0_21] : memref<8x1xf32, #tpu.memory_space<vmem>>, vector<8x1xf32>
      tpu.vector_store %arg4[%c0_20, %c0_21], %42 {strides = array<i32>} : memref<8x1xf32, #tpu.memory_space<vmem>>, vector<8x1xf32>,
      %c0_22 = arith.constant 0 : index
      %c0_23 = arith.constant 0 : index
      %44 = vector.load %arg7[%c0_22, %c0_23] : memref<8x128xf32, #tpu.memory_space<vmem>>, vector<8x128xf32>
      %cst_24 = arith.constant dense<0.000000e+00> : vector<8xf32>
      %45 = vector.multi_reduction <add>, %44, %cst_24 [1] : vector<8x128xf32> to vector<8xf32>
      %46 = vector.shape_cast %45 : vector<8xf32> to vector<8x1xf32>
      %c0_25 = arith.constant 0 : index
      %c0_26 = arith.constant 0 : index
      %47 = vector.load %arg5[%c0_25, %c0_26] : memref<8x1xf32, #tpu.memory_space<vmem>>, vector<8x1xf32>
      tpu.vector_store %arg5[%c0_25, %c0_26], %46 {strides = array<i32>} : memref<8x1xf32, #tpu.memory_space<vmem>>, vector<8x1xf32>,
    } else {
    }
    return
  }
  func.func @transform_0(%arg0: i32, %arg1: i32) -> (i32, i32) {
    %c0_i32 = arith.constant 0 : i32
    return %arg0, %arg1 : i32, i32
  }
  func.func @transform_1(%arg0: i32, %arg1: i32) -> (i32, i32) {
    %c0_i32 = arith.constant 0 : i32
    return %arg0, %arg1 : i32, i32
  }
  func.func @transform_2(%arg0: i32, %arg1: i32) -> (i32, i32) {
    %c0_i32 = arith.constant 0 : i32
    %c0_i32_0 = arith.constant 0 : i32
    return %arg0, %c0_i32 : i32, i32
  }
  func.func @transform_3(%arg0: i32, %arg1: i32) -> (i32, i32) {
    %c0_i32 = arith.constant 0 : i32
    %c0_i32_0 = arith.constant 0 : i32
    return %arg0, %c0_i32 : i32, i32
  }
}

</mosaic_0001>

<bundles_post_ra>
// kernel: dice_loss.1
= control target key start
LH: loop header
LB: loop body
LE: loop exit
PB: predicated region body
PF: predicated region fallthrough
CT: control target
= control target key end

     0   :  { %vm55_vm0 = vcmask 7168   ;;  %s119_s0 = inlined_call_operand.vmem [shape: f32[8,256], index: 0, kind: input, shape index: {}]   ;;  %s120_s1 = inlined_call_operand.vmem [shape: f32[8,256], index: 1, kind: input, shape index: {}]   ;;  %s121_s2 = inlined_call_operand.vmem [shape: f32[8,1], index: 2, kind: output, shape index: {0}]   ;;  %s122_s3 = inlined_call_operand.vmem [shape: f32[8,1], index: 3, kind: output, shape index: {1}]  }
   0x1   :  { %v21_v0 = vld [vmem:[%s119_s0] sm:$0xff]  ;;  %v70_v1 = vld [vmem:[%s119_s0 + $0x8] sm:$0xff] }
   0x2   :  { %v69_v2 = vmul.f32 -1.442695, %v21_v0  ;;  %v71_v3 = vmul.f32 -1.442695, %v70_v1  ;;  %v28_v8 = vld [vmem:[%s120_s1] sm:$0xff]  ;;  %v72_v9 = vld [vmem:[%s120_s1 + $0x8] sm:$0xff] }
   0x4   :  { %73 = vpow2.f32 %v69_v2 }
   0x5   :  { %75 = vpow2.f32 %v71_v3 }
  0x11   :  { %v74_v4 = vpop.eup %73 }
  0x12   :  { %v76_v5 = vpop.eup %75  ;;  %v25_v6 = vadd.f32 1.0, %v74_v4 }
  0x13   :  { %v38_v7 = vadd.f32 1.0, %v76_v5 }
  0x14   :  { %77 = vrcp.f32 %v25_v6 }
  0x15   :  { %79 = vrcp.f32 %v38_v7 }
  0x21   :  { %v78_v10 = vpop.eup %77 }
  0x22   :  { %v80_v11 = vpop.eup %79  ;;  %v29_v12 = vmul.f32 %v78_v10, %v28_v8  ;;  %v32_v13 = vadd.f32 %v78_v10, %v28_v8 }
  0x23   :  { %v43_v14 = vmul.f32 %v80_v11, %v72_v9 }
  0x24   :  { %v45_v15 = vadd.f32 %v80_v11, %v32_v13 }
  0x25   :  { %v44_v16 = vadd.f32 %v43_v14, %v29_v12 }
  0x26   :  { %v46_v17 = vadd.f32 %v72_v9, %v45_v15 }
  0x27   :  { %53 = vadd.xlane.f32.xlu0 %v44_v16 }
  0x2b   :  { %58 = vadd.xlane.f32.xlu0 %v46_v17 }
  0xb0   :  { %v54_v18 = vpop.xlane.xlu0 %53 }
  0xb1   :  { %56 = vst.msk [vmem:[%s121_s2] sm:$0xff] %vm55_vm0, %v54_v18 }
  0xb4   :  { %v59_v19 = vpop.xlane.xlu0 %58 }
  0xb5   :  { %60 = vst.msk [vmem:[%s122_s3] sm:$0xff] %vm55_vm0, %v59_v19 }

</bundles_post_ra>
